<compile_context>
chip_gen: v7x
topology: tpu7x:2x2x1
jax: 0.10.0
libtpu: 0.0.40
codegen_flags: <defaults>
</compile_context>

<pallas_src>
import functools

import jax
import jax.numpy as jnp
from jax.experimental import pallas as pl
from jax.experimental.pallas import tpu as pltpu

PAD = 0  # constants.PAD


# ----------------------------------------------------------------------------
# Pallas kernel: per-row DMA gather of token rows (+ pipelined pos slab), add.
# ----------------------------------------------------------------------------
def _embed_kernel(ids_ref,            # scalar-prefetch: flattened ids (SMEM)
                  tok_hbm,            # token embedding table, raw HBM ref
                  *rest,              # [pos_ref,] out_ref, tok_buf, sems
                  tile_s, s_pad, use_pos):
    if use_pos:
        pos_ref, out_ref, tok_buf, sems = rest
    else:
        out_ref, tok_buf, sems = rest

    b = pl.program_id(0)
    si = pl.program_id(1)
    base = b * s_pad + si * tile_s

    # Issue all row-gather DMAs for this tile before waiting on any of them.
    # tile_s is a small static int -> the Python loop fully unrolls at trace
    # time (static scratch/semaphore indices, all copies concurrently in flight).
    copies = []
    for j in range(tile_s):
        row = ids_ref[base + j]
        cp = pltpu.make_async_copy(tok_hbm.at[pl.ds(row, 1), :],
                                   tok_buf.at[pl.ds(j, 1), :],
                                   sems.at[j])
        cp.start()
        copies.append(cp)
    for cp in copies:
        cp.wait()

    # word_rep = token_emb (+ pos_emb).  Dropout(p=dropout_emb) eval == identity.
    if use_pos:
        out_ref[...] = tok_buf[...] + pos_ref[...]
    else:
        out_ref[...] = tok_buf[...]


def _embed_pallas(ids_flat, tok_table, pos_slab, *, b, s_pad, tile_s):
    e = tok_table.shape[1]
    use_pos = pos_slab is not None
    num_s_tiles = s_pad // tile_s

    kernel = functools.partial(_embed_kernel, tile_s=tile_s, s_pad=s_pad,
                               use_pos=use_pos)

    in_specs = [pl.BlockSpec(memory_space=pl.ANY)]          # token table in HBM
    args = [ids_flat, tok_table]
    if use_pos:
        # Contiguous positional slab: auto-pipelined (tile_s, E) blocks.
        in_specs.append(pl.BlockSpec((tile_s, e), lambda bb, si, ids: (si, 0)))
        args.append(pos_slab)

    return pl.pallas_call(
        kernel,
        out_shape=jax.ShapeDtypeStruct((b, s_pad, e), jnp.float32),
        grid_spec=pltpu.PrefetchScalarGridSpec(
            num_scalar_prefetch=1,                 # flattened ids -> SMEM
            grid=(b, num_s_tiles),
            in_specs=in_specs,
            out_specs=pl.BlockSpec((None, tile_s, e),
                                   lambda bb, si, ids: (bb, si, 0)),
            scratch_shapes=[
                pltpu.VMEM((tile_s, e), jnp.float32),   # gathered token rows
                pltpu.SemaphoreType.DMA((tile_s,)),     # per-row DMA semaphores
            ],
        ),
        compiler_params=pltpu.CompilerParams(
            dimension_semantics=("parallel", "parallel"),   # megacore-friendly
        ),
    )(*args)


# ----------------------------------------------------------------------------
# Parameter construction (deterministic, mimics the module's __init__ shapes).
# ----------------------------------------------------------------------------
def init_embedder_params(key, *, emsize, vocab_size, type_vocab_size,
                         attr_vocab_size, sep_vocab_size, identi_vocab_size,
                         max_src_len, max_tgt_len):
    keys = jax.random.split(key, 8)

    def _emb(k, rows, zero_pad_row):
        t = 0.02 * jax.random.normal(k, (rows, emsize), jnp.float32)
        if zero_pad_row:
            t = t.at[PAD].set(0.0)  # padding_idx=PAD row is zero at init
        return t

    return {
        "word_embeddings":       _emb(keys[0], vocab_size, True),
        "type_embeddings":       _emb(keys[1], type_vocab_size, True),
        "attr_embeddings":       _emb(keys[2], attr_vocab_size, True),
        "sep_embeddings":        _emb(keys[3], sep_vocab_size, True),
        "identi_embeddings":     _emb(keys[4], identi_vocab_size, True),
        "src_pos_embeddings":    _emb(keys[5], max_src_len, False),
        "tgt_pos_embeddings":    _emb(keys[6], max_tgt_len + 2, False),
        "identi_pos_embeddings": _emb(keys[7], max_tgt_len + 2, False),
    }


# ----------------------------------------------------------------------------
# Forward pass (mode dispatch in plain Python; gather + fused add in kernel).
# ----------------------------------------------------------------------------
def _round_up(x, m):
    return ((x + m - 1) // m) * m


def embedder_forward(params, sequence, mode="encoder", step=None, *,
                     src_pos_emb=True, tgt_pos_emb=True, no_relative_pos=True,
                     max_tile=64):
    b, s = sequence.shape
    emsize = params["word_embeddings"].shape[1]

    pos_table = None
    pos_mode = "none"  # "none" | "arange" | "step"

    if mode == "encoder":
        tok_table = params["word_embeddings"]
        if src_pos_emb and no_relative_pos:
            pos_table = params["src_pos_embeddings"]
            pos_mode = "arange"
    elif mode in ("sep", "identi"):
        tok_table = (params["sep_embeddings"] if mode == "sep"
                     else params["identi_embeddings"])
        if tgt_pos_emb:
            pos_table = (params["tgt_pos_embeddings"] if mode == "sep"
                         else params["identi_pos_embeddings"])
            pos_mode = "arange" if step is None else "step"
    elif mode == "token":
        tok_table = params["word_embeddings"]
    elif mode == "type":
        tok_table = params["type_embeddings"]
    elif mode == "attrs":
        tok_table = params["attr_embeddings"]
    else:
        raise ValueError("Unknown embedder mode!")

    # Sequence tiling: tile_s multiple of 8, capped; pad S up to a multiple.
    tile_s = min(max_tile, _round_up(s, 8))
    s_pad = _round_up(s, tile_s)

    # Clamp indices (jnp.take-style) so a bad id can never drive an OOB DMA.
    v = tok_table.shape[0]
    ids = jnp.clip(sequence.astype(jnp.int32), 0, v - 1)
    if s_pad != s:
        ids = jnp.pad(ids, ((0, 0), (0, s_pad - s)))        # pad with PAD row id
    ids_flat = ids.reshape(b * s_pad)

    # Positional slab (contiguous, auto-pipelined by BlockSpec inside kernel).
    pos_slab = None
    if pos_mode == "arange":
        l = pos_table.shape[0]
        rows = min(s, l)                     # pos(arange(S)) == first S rows
        pos_slab = pos_table[:rows]
        if s_pad != rows:
            pos_slab = jnp.pad(pos_slab, ((0, s_pad - rows), (0, 0)))
    elif pos_mode == "step":
        l = pos_table.shape[0]
        step_idx = jnp.clip(jnp.asarray(step, jnp.int32), 0, l - 1)
        row = jax.lax.dynamic_slice_in_dim(pos_table, step_idx, 1, axis=0)
        pos_slab = jnp.broadcast_to(row, (s_pad, emsize))

    out = _embed_pallas(ids_flat, tok_table, pos_slab,
                        b=b, s_pad=s_pad, tile_s=tile_s)
    out = out[:, :s, :]
    # TODO(synk): the custom `Embeddings` wrapper class is not shown; it is
    # treated as a plain nn.Embedding with padding_idx=PAD (no sqrt scaling),
    # and dropout_emb is applied in eval mode (identity).
    return out


# Pure-JAX reference for correctness checks.
def _reference_forward(params, sequence, mode="encoder", step=None):
    b, s = sequence.shape
    if mode == "encoder":
        rep = jnp.take(params["word_embeddings"], sequence, axis=0)
        rep = rep + jnp.take(params["src_pos_embeddings"], jnp.arange(s), axis=0)[None]
    elif mode == "sep":
        rep = jnp.take(params["sep_embeddings"], sequence, axis=0)
        pos = jnp.arange(s) if step is None else jnp.full((s,), step)
        rep = rep + jnp.take(params["tgt_pos_embeddings"], pos, axis=0)[None]
    elif mode == "identi":
        rep = jnp.take(params["identi_embeddings"], sequence, axis=0)
        pos = jnp.arange(s) if step is None else jnp.full((s,), step)
        rep = rep + jnp.take(params["identi_pos_embeddings"], pos, axis=0)[None]
    elif mode == "token":
        rep = jnp.take(params["word_embeddings"], sequence, axis=0)
    elif mode == "type":
        rep = jnp.take(params["type_embeddings"], sequence, axis=0)
    elif mode == "attrs":
        rep = jnp.take(params["attr_embeddings"], sequence, axis=0)
    else:
        raise ValueError
    return rep


if __name__ == "__main__":
    # Small, module-consistent sizes.  E=128 keeps the output lane-dense.
    B, S, E = 2, 8, 128
    VOCAB, TYPE_V, ATTR_V, SEP_V, IDENTI_V = 64, 16, 16, 16, 16
    MAX_SRC_LEN, MAX_TGT_LEN = 16, 10

    key = jax.random.PRNGKey(0)
    pkey, skey = jax.random.split(key)

    params = init_embedder_params(
        pkey, emsize=E, vocab_size=VOCAB, type_vocab_size=TYPE_V,
        attr_vocab_size=ATTR_V, sep_vocab_size=SEP_V, identi_vocab_size=IDENTI_V,
        max_src_len=MAX_SRC_LEN, max_tgt_len=MAX_TGT_LEN)

    sequence = jax.random.randint(skey, (B, S), 0, VOCAB, dtype=jnp.int32)

    # Encoder mode (token DMA gather + pipelined positional slab + fused add), jitted.
    fwd = jax.jit(functools.partial(embedder_forward, mode="encoder"))
    out = fwd(params, sequence)
    jax.block_until_ready(out)
    ref = _reference_forward(params, sequence, mode="encoder")
    assert out.shape == (B, S, E)
    assert jnp.allclose(out, ref, atol=1e-5), "mismatch vs reference (encoder)"

    # Decoder-style single-step mode (all positions == step).
    seq_sep = jax.random.randint(skey, (B, 1), 0, SEP_V, dtype=jnp.int32)
    out_sep = embedder_forward(params, seq_sep, mode="sep", step=3)
    jax.block_until_ready(out_sep)
    ref_sep = _reference_forward(params, seq_sep, mode="sep", step=3)
    assert jnp.allclose(out_sep, ref_sep, atol=1e-5), "mismatch vs reference (sep)"

    # Mode without positional embeddings (exercises the use_pos=False kernel).
    seq_type = jax.random.randint(skey, (B, S), 0, TYPE_V, dtype=jnp.int32)
    out_type = embedder_forward(params, seq_type, mode="type")
    jax.block_until_ready(out_type)
    ref_type = _reference_forward(params, seq_type, mode="type")
    assert jnp.allclose(out_type, ref_type, atol=1e-5), "mismatch vs reference (type)"

    print("KERNEL_OK")
</pallas_src>

<mosaic_0001>
module attributes {stable_mosaic.version = 11 : i64} {
  func.func @_embed_kernel(%arg0: i32, %arg1: i32, %arg2: memref<16xi32, #tpu.memory_space<smem>>, %arg3: memref<64x128xf32, #tpu.memory_space<any>>, %arg4: memref<8x128xf32, #tpu.memory_space<vmem>>, %arg5: memref<1x8x128xf32, #tpu.memory_space<vmem>>, %arg6: memref<8x128xf32, #tpu.memory_space<vmem>>, %arg7: memref<8x!tpu.dma_semaphore, #tpu.memory_space<semaphore_mem>>) attributes {dimension_semantics = [#tpu.dimension_semantics<parallel>, #tpu.dimension_semantics<parallel>], iteration_bounds = array<i64: 2, 1>, scalar_prefetch = 1 : i64, scratch_operands = 2 : i64, tpu.core_type = #tpu.core_type<tc>, window_params = [{}, {transform_indices = @transform_1, window_bounds = array<i64: 8, 128>}, {transform_indices = @transform_2, window_bounds = array<i64: 1, 8, 128>}]} {
    %c8_i32 = arith.constant 8 : i32
    %0 = arith.muli %arg0, %c8_i32 : i32
    %c8_i32_0 = arith.constant 8 : i32
    %1 = arith.muli %arg1, %c8_i32_0 : i32
    %2 = arith.addi %0, %1 : i32
    %c0_i32 = arith.constant 0 : i32
    %3 = arith.addi %2, %c0_i32 : i32
    %4 = arith.index_cast %3 : i32 to index
    %5 = memref.load %arg2[%4] : memref<16xi32, #tpu.memory_space<smem>>
    %c0_i32_1 = arith.constant 0 : i32
    %c0_i32_2 = arith.constant 0 : i32
    %6 = tpu.memref_slice %arg3[%5, %c0_i32_2] : memref<64x128xf32, #tpu.memory_space<any>> -> memref<1x128xf32, #tpu.memory_space<any>>
    %c0_i32_3 = arith.constant 0 : i32
    %c0_i32_4 = arith.constant 0 : i32
    %7 = tpu.memref_slice %arg6[%c0_i32_3, %c0_i32_4] : memref<8x128xf32, #tpu.memory_space<vmem>> -> memref<1x128xf32, #tpu.memory_space<vmem>>
    %8 = tpu.memref_slice %arg7[%c0_i32_1] : memref<8x!tpu.dma_semaphore, #tpu.memory_space<semaphore_mem>> -> memref<1x!tpu.dma_semaphore, #tpu.memory_space<semaphore_mem>>
    %9 = tpu.memref_squeeze %8 : memref<1x!tpu.dma_semaphore, #tpu.memory_space<semaphore_mem>> -> memref<!tpu.dma_semaphore, #tpu.memory_space<semaphore_mem>>
    tpu.enqueue_dma source(%6 : memref<1x128xf32, #tpu.memory_space<any>>) target(%7 : memref<1x128xf32, #tpu.memory_space<vmem>>) target_semaphore(%9 : memref<!tpu.dma_semaphore, #tpu.memory_space<semaphore_mem>>)
    %c1_i32 = arith.constant 1 : i32
    %10 = arith.addi %2, %c1_i32 : i32
    %11 = arith.index_cast %10 : i32 to index
    %12 = memref.load %arg2[%11] : memref<16xi32, #tpu.memory_space<smem>>
    %c1_i32_5 = arith.constant 1 : i32
    %c0_i32_6 = arith.constant 0 : i32
    %13 = tpu.memref_slice %arg3[%12, %c0_i32_6] : memref<64x128xf32, #tpu.memory_space<any>> -> memref<1x128xf32, #tpu.memory_space<any>>
    %c1_i32_7 = arith.constant 1 : i32
    %c0_i32_8 = arith.constant 0 : i32
    %14 = tpu.memref_slice %arg6[%c1_i32_7, %c0_i32_8] : memref<8x128xf32, #tpu.memory_space<vmem>> -> memref<1x128xf32, #tpu.memory_space<vmem>>
    %15 = tpu.memref_slice %arg7[%c1_i32_5] : memref<8x!tpu.dma_semaphore, #tpu.memory_space<semaphore_mem>> -> memref<1x!tpu.dma_semaphore, #tpu.memory_space<semaphore_mem>>
    %16 = tpu.memref_squeeze %15 : memref<1x!tpu.dma_semaphore, #tpu.memory_space<semaphore_mem>> -> memref<!tpu.dma_semaphore, #tpu.memory_space<semaphore_mem>>
    tpu.enqueue_dma source(%13 : memref<1x128xf32, #tpu.memory_space<any>>) target(%14 : memref<1x128xf32, #tpu.memory_space<vmem>>) target_semaphore(%16 : memref<!tpu.dma_semaphore, #tpu.memory_space<semaphore_mem>>)
    %c2_i32 = arith.constant 2 : i32
    %17 = arith.addi %2, %c2_i32 : i32
    %18 = arith.index_cast %17 : i32 to index
    %19 = memref.load %arg2[%18] : memref<16xi32, #tpu.memory_space<smem>>
    %c2_i32_9 = arith.constant 2 : i32
    %c0_i32_10 = arith.constant 0 : i32
    %20 = tpu.memref_slice %arg3[%19, %c0_i32_10] : memref<64x128xf32, #tpu.memory_space<any>> -> memref<1x128xf32, #tpu.memory_space<any>>
    %c2_i32_11 = arith.constant 2 : i32
    %c0_i32_12 = arith.constant 0 : i32
    %21 = tpu.memref_slice %arg6[%c2_i32_11, %c0_i32_12] : memref<8x128xf32, #tpu.memory_space<vmem>> -> memref<1x128xf32, #tpu.memory_space<vmem>>
    %22 = tpu.memref_slice %arg7[%c2_i32_9] : memref<8x!tpu.dma_semaphore, #tpu.memory_space<semaphore_mem>> -> memref<1x!tpu.dma_semaphore, #tpu.memory_space<semaphore_mem>>
    %23 = tpu.memref_squeeze %22 : memref<1x!tpu.dma_semaphore, #tpu.memory_space<semaphore_mem>> -> memref<!tpu.dma_semaphore, #tpu.memory_space<semaphore_mem>>
    tpu.enqueue_dma source(%20 : memref<1x128xf32, #tpu.memory_space<any>>) target(%21 : memref<1x128xf32, #tpu.memory_space<vmem>>) target_semaphore(%23 : memref<!tpu.dma_semaphore, #tpu.memory_space<semaphore_mem>>)
    %c3_i32 = arith.constant 3 : i32
    %24 = arith.addi %2, %c3_i32 : i32
    %25 = arith.index_cast %24 : i32 to index
    %26 = memref.load %arg2[%25] : memref<16xi32, #tpu.memory_space<smem>>
    %c3_i32_13 = arith.constant 3 : i32
    %c0_i32_14 = arith.constant 0 : i32
    %27 = tpu.memref_slice %arg3[%26, %c0_i32_14] : memref<64x128xf32, #tpu.memory_space<any>> -> memref<1x128xf32, #tpu.memory_space<any>>
    %c3_i32_15 = arith.constant 3 : i32
    %c0_i32_16 = arith.constant 0 : i32
    %28 = tpu.memref_slice %arg6[%c3_i32_15, %c0_i32_16] : memref<8x128xf32, #tpu.memory_space<vmem>> -> memref<1x128xf32, #tpu.memory_space<vmem>>
    %29 = tpu.memref_slice %arg7[%c3_i32_13] : memref<8x!tpu.dma_semaphore, #tpu.memory_space<semaphore_mem>> -> memref<1x!tpu.dma_semaphore, #tpu.memory_space<semaphore_mem>>
    %30 = tpu.memref_squeeze %29 : memref<1x!tpu.dma_semaphore, #tpu.memory_space<semaphore_mem>> -> memref<!tpu.dma_semaphore, #tpu.memory_space<semaphore_mem>>
    tpu.enqueue_dma source(%27 : memref<1x128xf32, #tpu.memory_space<any>>) target(%28 : memref<1x128xf32, #tpu.memory_space<vmem>>) target_semaphore(%30 : memref<!tpu.dma_semaphore, #tpu.memory_space<semaphore_mem>>)
    %c4_i32 = arith.constant 4 : i32
    %31 = arith.addi %2, %c4_i32 : i32
    %32 = arith.index_cast %31 : i32 to index
    %33 = memref.load %arg2[%32] : memref<16xi32, #tpu.memory_space<smem>>
    %c4_i32_17 = arith.constant 4 : i32
    %c0_i32_18 = arith.constant 0 : i32
    %34 = tpu.memref_slice %arg3[%33, %c0_i32_18] : memref<64x128xf32, #tpu.memory_space<any>> -> memref<1x128xf32, #tpu.memory_space<any>>
    %c4_i32_19 = arith.constant 4 : i32
    %c0_i32_20 = arith.constant 0 : i32
    %35 = tpu.memref_slice %arg6[%c4_i32_19, %c0_i32_20] : memref<8x128xf32, #tpu.memory_space<vmem>> -> memref<1x128xf32, #tpu.memory_space<vmem>>
    %36 = tpu.memref_slice %arg7[%c4_i32_17] : memref<8x!tpu.dma_semaphore, #tpu.memory_space<semaphore_mem>> -> memref<1x!tpu.dma_semaphore, #tpu.memory_space<semaphore_mem>>
    %37 = tpu.memref_squeeze %36 : memref<1x!tpu.dma_semaphore, #tpu.memory_space<semaphore_mem>> -> memref<!tpu.dma_semaphore, #tpu.memory_space<semaphore_mem>>
    tpu.enqueue_dma source(%34 : memref<1x128xf32, #tpu.memory_space<any>>) target(%35 : memref<1x128xf32, #tpu.memory_space<vmem>>) target_semaphore(%37 : memref<!tpu.dma_semaphore, #tpu.memory_space<semaphore_mem>>)
    %c5_i32 = arith.constant 5 : i32
    %38 = arith.addi %2, %c5_i32 : i32
    %39 = arith.index_cast %38 : i32 to index
    %40 = memref.load %arg2[%39] : memref<16xi32, #tpu.memory_space<smem>>
    %c5_i32_21 = arith.constant 5 : i32
    %c0_i32_22 = arith.constant 0 : i32
    %41 = tpu.memref_slice %arg3[%40, %c0_i32_22] : memref<64x128xf32, #tpu.memory_space<any>> -> memref<1x128xf32, #tpu.memory_space<any>>
    %c5_i32_23 = arith.constant 5 : i32
    %c0_i32_24 = arith.constant 0 : i32
    %42 = tpu.memref_slice %arg6[%c5_i32_23, %c0_i32_24] : memref<8x128xf32, #tpu.memory_space<vmem>> -> memref<1x128xf32, #tpu.memory_space<vmem>>
    %43 = tpu.memref_slice %arg7[%c5_i32_21] : memref<8x!tpu.dma_semaphore, #tpu.memory_space<semaphore_mem>> -> memref<1x!tpu.dma_semaphore, #tpu.memory_space<semaphore_mem>>
    %44 = tpu.memref_squeeze %43 : memref<1x!tpu.dma_semaphore, #tpu.memory_space<semaphore_mem>> -> memref<!tpu.dma_semaphore, #tpu.memory_space<semaphore_mem>>
    tpu.enqueue_dma source(%41 : memref<1x128xf32, #tpu.memory_space<any>>) target(%42 : memref<1x128xf32, #tpu.memory_space<vmem>>) target_semaphore(%44 : memref<!tpu.dma_semaphore, #tpu.memory_space<semaphore_mem>>)
    %c6_i32 = arith.constant 6 : i32
    %45 = arith.addi %2, %c6_i32 : i32
    %46 = arith.index_cast %45 : i32 to index
    %47 = memref.load %arg2[%46] : memref<16xi32, #tpu.memory_space<smem>>
    %c6_i32_25 = arith.constant 6 : i32
    %c0_i32_26 = arith.constant 0 : i32
    %48 = tpu.memref_slice %arg3[%47, %c0_i32_26] : memref<64x128xf32, #tpu.memory_space<any>> -> memref<1x128xf32, #tpu.memory_space<any>>
    %c6_i32_27 = arith.constant 6 : i32
    %c0_i32_28 = arith.constant 0 : i32
    %49 = tpu.memref_slice %arg6[%c6_i32_27, %c0_i32_28] : memref<8x128xf32, #tpu.memory_space<vmem>> -> memref<1x128xf32, #tpu.memory_space<vmem>>
    %50 = tpu.memref_slice %arg7[%c6_i32_25] : memref<8x!tpu.dma_semaphore, #tpu.memory_space<semaphore_mem>> -> memref<1x!tpu.dma_semaphore, #tpu.memory_space<semaphore_mem>>
    %51 = tpu.memref_squeeze %50 : memref<1x!tpu.dma_semaphore, #tpu.memory_space<semaphore_mem>> -> memref<!tpu.dma_semaphore, #tpu.memory_space<semaphore_mem>>
    tpu.enqueue_dma source(%48 : memref<1x128xf32, #tpu.memory_space<any>>) target(%49 : memref<1x128xf32, #tpu.memory_space<vmem>>) target_semaphore(%51 : memref<!tpu.dma_semaphore, #tpu.memory_space<semaphore_mem>>)
    %c7_i32 = arith.constant 7 : i32
    %52 = arith.addi %2, %c7_i32 : i32
    %53 = arith.index_cast %52 : i32 to index
    %54 = memref.load %arg2[%53] : memref<16xi32, #tpu.memory_space<smem>>
    %c7_i32_29 = arith.constant 7 : i32
    %c0_i32_30 = arith.constant 0 : i32
    %55 = tpu.memref_slice %arg3[%54, %c0_i32_30] : memref<64x128xf32, #tpu.memory_space<any>> -> memref<1x128xf32, #tpu.memory_space<any>>
    %c7_i32_31 = arith.constant 7 : i32
    %c0_i32_32 = arith.constant 0 : i32
    %56 = tpu.memref_slice %arg6[%c7_i32_31, %c0_i32_32] : memref<8x128xf32, #tpu.memory_space<vmem>> -> memref<1x128xf32, #tpu.memory_space<vmem>>
    %57 = tpu.memref_slice %arg7[%c7_i32_29] : memref<8x!tpu.dma_semaphore, #tpu.memory_space<semaphore_mem>> -> memref<1x!tpu.dma_semaphore, #tpu.memory_space<semaphore_mem>>
    %58 = tpu.memref_squeeze %57 : memref<1x!tpu.dma_semaphore, #tpu.memory_space<semaphore_mem>> -> memref<!tpu.dma_semaphore, #tpu.memory_space<semaphore_mem>>
    tpu.enqueue_dma source(%55 : memref<1x128xf32, #tpu.memory_space<any>>) target(%56 : memref<1x128xf32, #tpu.memory_space<vmem>>) target_semaphore(%58 : memref<!tpu.dma_semaphore, #tpu.memory_space<semaphore_mem>>)
    %c0_i32_33 = arith.constant 0 : i32
    %c0_i32_34 = arith.constant 0 : i32
    %59 = tpu.memref_slice %arg3[%5, %c0_i32_34] : memref<64x128xf32, #tpu.memory_space<any>> -> memref<1x128xf32, #tpu.memory_space<any>>
    %c0_i32_35 = arith.constant 0 : i32
    %c0_i32_36 = arith.constant 0 : i32
    %60 = tpu.memref_slice %arg6[%c0_i32_35, %c0_i32_36] : memref<8x128xf32, #tpu.memory_space<vmem>> -> memref<1x128xf32, #tpu.memory_space<vmem>>
    %61 = tpu.memref_slice %arg7[%c0_i32_33] : memref<8x!tpu.dma_semaphore, #tpu.memory_space<semaphore_mem>> -> memref<1x!tpu.dma_semaphore, #tpu.memory_space<semaphore_mem>>
    %62 = tpu.memref_squeeze %61 : memref<1x!tpu.dma_semaphore, #tpu.memory_space<semaphore_mem>> -> memref<!tpu.dma_semaphore, #tpu.memory_space<semaphore_mem>>
    tpu.wait_dma2 semaphore(%62 : memref<!tpu.dma_semaphore, #tpu.memory_space<semaphore_mem>>) src(%59 : memref<1x128xf32, #tpu.memory_space<any>>) dst(%60 : memref<1x128xf32, #tpu.memory_space<vmem>>)
    %c1_i32_37 = arith.constant 1 : i32
    %c0_i32_38 = arith.constant 0 : i32
    %63 = tpu.memref_slice %arg3[%12, %c0_i32_38] : memref<64x128xf32, #tpu.memory_space<any>> -> memref<1x128xf32, #tpu.memory_space<any>>
    %c1_i32_39 = arith.constant 1 : i32
    %c0_i32_40 = arith.constant 0 : i32
    %64 = tpu.memref_slice %arg6[%c1_i32_39, %c0_i32_40] : memref<8x128xf32, #tpu.memory_space<vmem>> -> memref<1x128xf32, #tpu.memory_space<vmem>>
    %65 = tpu.memref_slice %arg7[%c1_i32_37] : memref<8x!tpu.dma_semaphore, #tpu.memory_space<semaphore_mem>> -> memref<1x!tpu.dma_semaphore, #tpu.memory_space<semaphore_mem>>
    %66 = tpu.memref_squeeze %65 : memref<1x!tpu.dma_semaphore, #tpu.memory_space<semaphore_mem>> -> memref<!tpu.dma_semaphore, #tpu.memory_space<semaphore_mem>>
    tpu.wait_dma2 semaphore(%66 : memref<!tpu.dma_semaphore, #tpu.memory_space<semaphore_mem>>) src(%63 : memref<1x128xf32, #tpu.memory_space<any>>) dst(%64 : memref<1x128xf32, #tpu.memory_space<vmem>>)
    %c2_i32_41 = arith.constant 2 : i32
    %c0_i32_42 = arith.constant 0 : i32
    %67 = tpu.memref_slice %arg3[%19, %c0_i32_42] : memref<64x128xf32, #tpu.memory_space<any>> -> memref<1x128xf32, #tpu.memory_space<any>>
    %c2_i32_43 = arith.constant 2 : i32
    %c0_i32_44 = arith.constant 0 : i32
    %68 = tpu.memref_slice %arg6[%c2_i32_43, %c0_i32_44] : memref<8x128xf32, #tpu.memory_space<vmem>> -> memref<1x128xf32, #tpu.memory_space<vmem>>
    %69 = tpu.memref_slice %arg7[%c2_i32_41] : memref<8x!tpu.dma_semaphore, #tpu.memory_space<semaphore_mem>> -> memref<1x!tpu.dma_semaphore, #tpu.memory_space<semaphore_mem>>
    %70 = tpu.memref_squeeze %69 : memref<1x!tpu.dma_semaphore, #tpu.memory_space<semaphore_mem>> -> memref<!tpu.dma_semaphore, #tpu.memory_space<semaphore_mem>>
    tpu.wait_dma2 semaphore(%70 : memref<!tpu.dma_semaphore, #tpu.memory_space<semaphore_mem>>) src(%67 : memref<1x128xf32, #tpu.memory_space<any>>) dst(%68 : memref<1x128xf32, #tpu.memory_space<vmem>>)
    %c3_i32_45 = arith.constant 3 : i32
    %c0_i32_46 = arith.constant 0 : i32
    %71 = tpu.memref_slice %arg3[%26, %c0_i32_46] : memref<64x128xf32, #tpu.memory_space<any>> -> memref<1x128xf32, #tpu.memory_space<any>>
    %c3_i32_47 = arith.constant 3 : i32
    %c0_i32_48 = arith.constant 0 : i32
    %72 = tpu.memref_slice %arg6[%c3_i32_47, %c0_i32_48] : memref<8x128xf32, #tpu.memory_space<vmem>> -> memref<1x128xf32, #tpu.memory_space<vmem>>
    %73 = tpu.memref_slice %arg7[%c3_i32_45] : memref<8x!tpu.dma_semaphore, #tpu.memory_space<semaphore_mem>> -> memref<1x!tpu.dma_semaphore, #tpu.memory_space<semaphore_mem>>
    %74 = tpu.memref_squeeze %73 : memref<1x!tpu.dma_semaphore, #tpu.memory_space<semaphore_mem>> -> memref<!tpu.dma_semaphore, #tpu.memory_space<semaphore_mem>>
    tpu.wait_dma2 semaphore(%74 : memref<!tpu.dma_semaphore, #tpu.memory_space<semaphore_mem>>) src(%71 : memref<1x128xf32, #tpu.memory_space<any>>) dst(%72 : memref<1x128xf32, #tpu.memory_space<vmem>>)
    %c4_i32_49 = arith.constant 4 : i32
    %c0_i32_50 = arith.constant 0 : i32
    %75 = tpu.memref_slice %arg3[%33, %c0_i32_50] : memref<64x128xf32, #tpu.memory_space<any>> -> memref<1x128xf32, #tpu.memory_space<any>>
    %c4_i32_51 = arith.constant 4 : i32
    %c0_i32_52 = arith.constant 0 : i32
    %76 = tpu.memref_slice %arg6[%c4_i32_51, %c0_i32_52] : memref<8x128xf32, #tpu.memory_space<vmem>> -> memref<1x128xf32, #tpu.memory_space<vmem>>
    %77 = tpu.memref_slice %arg7[%c4_i32_49] : memref<8x!tpu.dma_semaphore, #tpu.memory_space<semaphore_mem>> -> memref<1x!tpu.dma_semaphore, #tpu.memory_space<semaphore_mem>>
    %78 = tpu.memref_squeeze %77 : memref<1x!tpu.dma_semaphore, #tpu.memory_space<semaphore_mem>> -> memref<!tpu.dma_semaphore, #tpu.memory_space<semaphore_mem>>
    tpu.wait_dma2 semaphore(%78 : memref<!tpu.dma_semaphore, #tpu.memory_space<semaphore_mem>>) src(%75 : memref<1x128xf32, #tpu.memory_space<any>>) dst(%76 : memref<1x128xf32, #tpu.memory_space<vmem>>)
    %c5_i32_53 = arith.constant 5 : i32
    %c0_i32_54 = arith.constant 0 : i32
    %79 = tpu.memref_slice %arg3[%40, %c0_i32_54] : memref<64x128xf32, #tpu.memory_space<any>> -> memref<1x128xf32, #tpu.memory_space<any>>
    %c5_i32_55 = arith.constant 5 : i32
    %c0_i32_56 = arith.constant 0 : i32
    %80 = tpu.memref_slice %arg6[%c5_i32_55, %c0_i32_56] : memref<8x128xf32, #tpu.memory_space<vmem>> -> memref<1x128xf32, #tpu.memory_space<vmem>>
    %81 = tpu.memref_slice %arg7[%c5_i32_53] : memref<8x!tpu.dma_semaphore, #tpu.memory_space<semaphore_mem>> -> memref<1x!tpu.dma_semaphore, #tpu.memory_space<semaphore_mem>>
    %82 = tpu.memref_squeeze %81 : memref<1x!tpu.dma_semaphore, #tpu.memory_space<semaphore_mem>> -> memref<!tpu.dma_semaphore, #tpu.memory_space<semaphore_mem>>
    tpu.wait_dma2 semaphore(%82 : memref<!tpu.dma_semaphore, #tpu.memory_space<semaphore_mem>>) src(%79 : memref<1x128xf32, #tpu.memory_space<any>>) dst(%80 : memref<1x128xf32, #tpu.memory_space<vmem>>)
    %c6_i32_57 = arith.constant 6 : i32
    %c0_i32_58 = arith.constant 0 : i32
    %83 = tpu.memref_slice %arg3[%47, %c0_i32_58] : memref<64x128xf32, #tpu.memory_space<any>> -> memref<1x128xf32, #tpu.memory_space<any>>
    %c6_i32_59 = arith.constant 6 : i32
    %c0_i32_60 = arith.constant 0 : i32
    %84 = tpu.memref_slice %arg6[%c6_i32_59, %c0_i32_60] : memref<8x128xf32, #tpu.memory_space<vmem>> -> memref<1x128xf32, #tpu.memory_space<vmem>>
    %85 = tpu.memref_slice %arg7[%c6_i32_57] : memref<8x!tpu.dma_semaphore, #tpu.memory_space<semaphore_mem>> -> memref<1x!tpu.dma_semaphore, #tpu.memory_space<semaphore_mem>>
    %86 = tpu.memref_squeeze %85 : memref<1x!tpu.dma_semaphore, #tpu.memory_space<semaphore_mem>> -> memref<!tpu.dma_semaphore, #tpu.memory_space<semaphore_mem>>
    tpu.wait_dma2 semaphore(%86 : memref<!tpu.dma_semaphore, #tpu.memory_space<semaphore_mem>>) src(%83 : memref<1x128xf32, #tpu.memory_space<any>>) dst(%84 : memref<1x128xf32, #tpu.memory_space<vmem>>)
    %c7_i32_61 = arith.constant 7 : i32
    %c0_i32_62 = arith.constant 0 : i32
    %87 = tpu.memref_slice %arg3[%54, %c0_i32_62] : memref<64x128xf32, #tpu.memory_space<any>> -> memref<1x128xf32, #tpu.memory_space<any>>
    %c7_i32_63 = arith.constant 7 : i32
    %c0_i32_64 = arith.constant 0 : i32
    %88 = tpu.memref_slice %arg6[%c7_i32_63, %c0_i32_64] : memref<8x128xf32, #tpu.memory_space<vmem>> -> memref<1x128xf32, #tpu.memory_space<vmem>>
    %89 = tpu.memref_slice %arg7[%c7_i32_61] : memref<8x!tpu.dma_semaphore, #tpu.memory_space<semaphore_mem>> -> memref<1x!tpu.dma_semaphore, #tpu.memory_space<semaphore_mem>>
    %90 = tpu.memref_squeeze %89 : memref<1x!tpu.dma_semaphore, #tpu.memory_space<semaphore_mem>> -> memref<!tpu.dma_semaphore, #tpu.memory_space<semaphore_mem>>
    tpu.wait_dma2 semaphore(%90 : memref<!tpu.dma_semaphore, #tpu.memory_space<semaphore_mem>>) src(%87 : memref<1x128xf32, #tpu.memory_space<any>>) dst(%88 : memref<1x128xf32, #tpu.memory_space<vmem>>)
    %c0 = arith.constant 0 : index
    %c0_65 = arith.constant 0 : index
    %91 = vector.load %arg6[%c0, %c0_65] : memref<8x128xf32, #tpu.memory_space<vmem>>, vector<8x128xf32>
    %c0_66 = arith.constant 0 : index
    %c0_67 = arith.constant 0 : index
    %92 = vector.load %arg4[%c0_66, %c0_67] : memref<8x128xf32, #tpu.memory_space<vmem>>, vector<8x128xf32>
    %93 = arith.addf %91, %92 : vector<8x128xf32>
    %c0_68 = arith.constant 0 : index
    %c0_69 = arith.constant 0 : index
    %c0_70 = arith.constant 0 : index
    %94 = vector.load %arg5[%c0_68, %c0_69, %c0_70] : memref<1x8x128xf32, #tpu.memory_space<vmem>>, vector<1x8x128xf32>
    %95 = vector.shape_cast %94 : vector<1x8x128xf32> to vector<8x128xf32>
    %96 = vector.shape_cast %93 : vector<8x128xf32> to vector<1x8x128xf32>
    tpu.vector_store %arg5[%c0_68, %c0_69, %c0_70], %96 {strides = array<i32>} : memref<1x8x128xf32, #tpu.memory_space<vmem>>, vector<1x8x128xf32>,
    return
  }
  func.func @transform_1(%arg0: i32, %arg1: i32, %arg2: memref<16xi32, #tpu.memory_space<smem>>) -> (i32, i32) {
    %c0_i32 = arith.constant 0 : i32
    %c0_i32_0 = arith.constant 0 : i32
    return %arg1, %c0_i32 : i32, i32
  }
  func.func @transform_2(%arg0: i32, %arg1: i32, %arg2: memref<16xi32, #tpu.memory_space<smem>>) -> (i32, i32, i32) {
    %c0_i32 = arith.constant 0 : i32
    %c0_i32_0 = arith.constant 0 : i32
    return %arg0, %arg1, %c0_i32 : i32, i32, i32
  }
}

</mosaic_0001>

<bundles_post_ra>
// kernel: embedder_forward.1
= control target key start
LH: loop header
LB: loop body
LE: loop exit
PB: predicated region body
PF: predicated region fallthrough
CT: control target
= control target key end

     0   :  { %s1118_s0 = inlined_call_operand.vmem [shape: s32[16], index: 0, kind: input, shape index: {}]   ;;  %s1119_s1 = inlined_call_operand.hbm [shape: f32[64,128], index: 1, kind: input, shape index: {}]   ;;  %s1120_s2 = inlined_call_operand.vmem [shape: f32[8,128], index: 2, kind: input, shape index: {}]   ;;  %s1121_s3 = inlined_call_operand.hbm [shape: f32[2,8,128], index: 3, kind: output, shape index: {}]  }
   0x1   :  { %s8_s14 = sshll.u32 %s1118_s0, 4  ;;  %s9_s14 = int_to_ptr.vmem [resolvable:$true] %s8_s14 }
   0x2   :  { %s539_s15 = scalar_lea.vmem %s9_s14, 16  ;;  %p544_p1 = scmp.lt.s32.totalorder %s9_s14, %s9_s14 }
   0x3   :  { %p540_p0 = scmp.ne.s32.totalorder %s9_s14, %s539_s15  ;;  %p545_p2 = scmp.lt.s32.totalorder %s539_s15, %s539_s15 }
   0x5   :  { %p546_p3 = por %p545_p2, %p544_p1 }
   0x7   :  { %p547_p4 = pnand %p546_p3, %p540_p0 }
   0x9   :  { %550 = shalt.err (!%p547_p4)  }
   0xa   :  { %s841_s16 = smov [#allocation5]  }
   0xb   :  { %11 = dma.vmem_to_smem %s9_s14, 16, %s841_s16, [#allocation4] }
   0xc   :  { %795 = dma.done.wait [#allocation4], 16 }
   0xd   :  { %796 = vsyncadd [#allocation4], 4294967280 }
   0xe   :  { %13 = sfence }
   0xf   :  { %14 = vsyncpa [#allocation7], 0 }
  0x10   :  { %16 = vsyncpa [#allocation7 + $0x1], 0  ;;  %s874_s17 = smov 0   ;;  %s876_s18 = smov 0  }
  0x11   :  { %s878_s0 = smov 0   ;;  %s880_s19 = smov 0  }
  0x12   :  { %s882_s20 = smov 0   ;;  %s884_s21 = smov 0  }
  0x13 LB: > { %1125 = sst [smem:[#allocation36_spill]] %s835_s20  ;;  %s448_s22 = sadd.s32 4294967295, %s839_s21   ;;  %s839_s21 = sphi %s884_s21, %s22_s21   ;;  %s835_s20 = sphi %s882_s20, %s1133_s20   ;;  %s831_s19 = sphi %s880_s19, %s1132_s19   ;;  %s827_s0 = sphi %s878_s0, %s1136_s0   ;;  %s823_s18 = sphi %s876_s18, %s1135_s18   ;;  %s819_s17 = sphi %s874_s17, %s1134_s17  }
  0x14   : > { %s449_s23 = sadd.s32 4294967294, %s839_s21   ;;  %s34_s24 = sadd.s32 1, %s835_s20 }
  0x15   : > { %s69_s25 = sadd.s32 1, %s827_s0  ;;  %p36_p5 = scmp.ge.s32.totalorder %s34_s24, 2 }
  0x16   : > { %p79_p6 = scmp.ne.s32.totalorder %s827_s0, %s823_s18  ;;  %p80_p7 = scmp.eq.s32.totalorder %s448_s22, 1 }
  0x17   : > { %p85_p8 = scmp.ne.s32.totalorder %s823_s18, %s819_s17  ;;  %s1138_s24 = smov (%p36_p5, %s34_s24), 0 }
  0x18   : > { %1126 = sst [smem:[#allocation37_spill]] %s1138_s24  ;;  %p914_p9 = por %p80_p7, %p79_p6 }
  0x19   : > { %p86_p10 = scmp.eq.s32.totalorder %s449_s23, 1  ;;  %s64_s27 = ssub.s32 %s835_s20, %s1138_s24 }
  0x1a   : > { %p452_p11 = scmp.ge.s32.totalorder %s839_s21, 1  ;;  %p67_p12 = scmp.eq.s32.totalorder %s64_s27, 0 }
  0x1b   : > { %p921_p13 = por %p86_p10, %p85_p8  ;;  %p111_p0 = scmp.lt.s32.totalorder %s839_s21, 3 }
  0x1c   : > { %s927_s29 = scalar_select %p67_p12, %s827_s0, %s69_s25  }
  0x1d   : > { %p112_p1 = pnand %p452_p11, %p111_p0 }
  0x1e   : > { %1129 = sst [smem:[#allocation38_spill]] %s927_s29  ;;  %s1122_s30 = sand.u32 (!%p112_p1), 1, %s823_s18  }
  0x1f   : > { %115 = sbr.rel (%p112_p1) target bundleno = 253 (0xfd), region = 24  ;;  %s931_s4 = sshll.u32 (!%p112_p1), %s831_s19, 3 }
  0x20   : > { %s935_s5 = sshll.u32 (!%p112_p1), %s1122_s30, 3  ;;  %s137_s6 = sld [smem:[#allocation5 + %s931_s4]] (!%p112_p1) }
  0x21   : > { %s842_s7 = smov (!%p112_p1), [#allocation2]   ;;  %s151_s9 = sadd.s32 (!%p112_p1), 1, %s931_s4 }
  0x22   : > { %s147_s8 = sshll.u32 (!%p112_p1), %s842_s7, 4  ;;  %s941_s10 = sld [smem:[#allocation5 + %s151_s9]] (!%p112_p1)  ;;  %s939_s8 = int_to_ptr.vmem [resolvable:$true] %s147_s8 }
  0x23   : > { %s168_s11 = sadd.s32 (!%p112_p1), 2, %s931_s4  ;;  %s843_s12 = smov (!%p112_p1), [#allocation2 + $0x1]  }
  0x24   : > { %s164_s13 = sshll.u32 (!%p112_p1), %s843_s12, 4  ;;  %s944_s14 = sld [smem:[#allocation5 + %s168_s11]] (!%p112_p1)  ;;  %s946_s13 = int_to_ptr.vmem [resolvable:$true] %s164_s13 }
  0x25   : > { %s954_s30 = scalar_lea.hbm (!%p112_p1), %s1119_s1, 1024 }
  0x26   : > { %s455_s15 = sshll.u32 %s137_s6, 4 }
  0x27   : > { %s139_s23 = scalar_lea.hbm %s1119_s1, %s455_s15 }
  0x28   : > { %s551_s25 = scalar_lea.hbm %s139_s23, 16  ;;  %p554_p3 = scmp.lt.u32.totalorder %s139_s23, %s1119_s1 }
  0x29   : > { %p552_p2 = scmp.ne.s32.totalorder %s139_s23, %s551_s25  ;;  %p555_p4 = scmp.lt.u32.totalorder %s954_s30, %s551_s25 }
  0x2a   : > { %p557_p6 = scmp.lt.u32.totalorder %s551_s25, %s139_s23 }
  0x2b   : > { %p556_p5 = por %p555_p4, %p554_p3 }
  0x2d   : > { %p558_p7 = por %p557_p6, %p556_p5 }
  0x2f   : > { %p559_p8 = pnand %p558_p7, %p552_p2 }
  0x31   : > { %562 = shalt.err (!%p559_p8)  }
  0x32   : > { %s563_s6 = scalar_lea.vmem %s939_s8, 16  ;;  %s963_s11 = scalar_lea.vmem %s939_s8, 128 }
  0x33   : > { %p564_p10 = scmp.ne.s32.totalorder %s939_s8, %s563_s6  ;;  %p568_p11 = scmp.lt.s32.totalorder %s939_s8, %s939_s8 }
  0x34   : > { %p569_p12 = scmp.lt.s32.totalorder %s963_s11, %s563_s6 }
  0x36   : > { %p570_p0 = por %p569_p12, %p568_p11 }
  0x38   : > { %p571_p1 = pnand %p570_p0, %p564_p10 }
  0x3a   : > { %574 = shalt.err (!%p571_p1)  }
  0x3b   : > { %150 = dma.hbm_to_vmem [thread:$0]  %s139_s23, 16, %s939_s8, [#allocation3] }
  0x3c   : > { %s456_s24 = sshll.u32 %s941_s10, 4  ;;  %s844_s12 = smov [#allocation2 + $0x2]  }
  0x3d   : > { %s181_s15 = sshll.u32 %s844_s12, 4  ;;  %s154_s25 = scalar_lea.hbm %s1119_s1, %s456_s24  ;;  %s973_s15 = int_to_ptr.vmem [resolvable:$true] %s181_s15 }
  0x3e   : > { %s575_s27 = scalar_lea.hbm %s154_s25, 16  ;;  %p578_p3 = scmp.lt.u32.totalorder %s154_s25, %s1119_s1 }
  0x3f   : > { %p576_p2 = scmp.ne.s32.totalorder %s154_s25, %s575_s27  ;;  %p579_p4 = scmp.lt.u32.totalorder %s954_s30, %s575_s27 }
  0x40   : > { %p581_p6 = scmp.lt.u32.totalorder %s575_s27, %s154_s25 }
  0x41   : > { %p580_p5 = por %p579_p4, %p578_p3 }
  0x43   : > { %p582_p7 = por %p581_p6, %p580_p5 }
  0x45   : > { %p583_p8 = pnand %p582_p7, %p576_p2 }
  0x47   : > { %586 = shalt.err (!%p583_p8)  }
  0x48   : > { %s587_s10 = scalar_lea.vmem %s946_s13, 16  ;;  %p592_p11 = scmp.lt.s32.totalorder %s946_s13, %s939_s8 }
  0x49   : > { %p588_p10 = scmp.ne.s32.totalorder %s946_s13, %s587_s10  ;;  %p593_p12 = scmp.lt.s32.totalorder %s963_s11, %s587_s10 }
  0x4b   : > { %p594_p0 = por %p593_p12, %p592_p11 }
  0x4d   : > { %p595_p1 = pnand %p594_p0, %p588_p10 }
  0x4f   : > { %598 = shalt.err (!%p595_p1)  }
  0x50   : > { %167 = dma.hbm_to_vmem [thread:$0]  %s154_s25, 16, %s946_s13, [#allocation3 + $0x1] }
  0x51   : > { %s457_s23 = sshll.u32 %s944_s14, 4  ;;  %s185_s6 = sadd.s32 3, %s931_s4 }
  0x52   : > { %s171_s16 = scalar_lea.hbm %s1119_s1, %s457_s23  ;;  %s990_s22 = sld [smem:[#allocation5 + %s185_s6]] }
  0x53   : > { %s599_s27 = scalar_lea.hbm %s171_s16, 16  ;;  %p602_p3 = scmp.lt.u32.totalorder %s171_s16, %s1119_s1 }
  0x54   : > { %p600_p2 = scmp.ne.s32.totalorder %s171_s16, %s599_s27  ;;  %p603_p4 = scmp.lt.u32.totalorder %s954_s30, %s599_s27 }
  0x55   : > { %p605_p6 = scmp.lt.u32.totalorder %s599_s27, %s171_s16 }
  0x56   : > { %p604_p5 = por %p603_p4, %p602_p3 }
  0x58   : > { %p606_p7 = por %p605_p6, %p604_p5 }
  0x5a   : > { %p607_p8 = pnand %p606_p7, %p600_p2 }
  0x5c   : > { %610 = shalt.err (!%p607_p8)  }
  0x5d   : > { %s611_s13 = scalar_lea.vmem %s973_s15, 16  ;;  %p616_p11 = scmp.lt.s32.totalorder %s973_s15, %s939_s8 }
  0x5e   : > { %p612_p10 = scmp.ne.s32.totalorder %s973_s15, %s611_s13  ;;  %p617_p12 = scmp.lt.s32.totalorder %s963_s11, %s611_s13 }
  0x60   : > { %p618_p0 = por %p617_p12, %p616_p11 }
  0x62   : > { %p619_p1 = pnand %p618_p0, %p612_p10 }
  0x64   : > { %622 = shalt.err (!%p619_p1)  }
  0x65   : > { %184 = dma.hbm_to_vmem [thread:$0]  %s171_s16, 16, %s973_s15, [#allocation3 + $0x2] }
  0x66   : > { %s202_s14 = sadd.s32 4, %s931_s4  ;;  %s845_s25 = smov [#allocation2 + $0x3]  }
  0x67   : > { %s198_s10 = sshll.u32 %s845_s25, 4  ;;  %s203_s23 = sld [smem:[#allocation5 + %s202_s14]]  ;;  %s199_s10 = int_to_ptr.vmem [resolvable:$true] %s198_s10 }
  0x68   : > { %s846_s6 = smov [#allocation2 + $0x4]   ;;  %s219_s12 = sadd.s32 5, %s931_s4 }
  0x69   : > { %s215_s24 = sshll.u32 %s846_s6, 4  ;;  %s458_s27 = sshll.u32 %s990_s22, 4  ;;  %s1005_s24 = int_to_ptr.vmem [resolvable:$true] %s215_s24 }
  0x6a   : > { %s188_s13 = scalar_lea.hbm %s1119_s1, %s458_s27  ;;  %s1010_s20 = sld [smem:[#allocation5 + %s219_s12]] }
  0x6b   : > { %s623_s29 = scalar_lea.hbm %s188_s13, 16  ;;  %p626_p3 = scmp.lt.u32.totalorder %s188_s13, %s1119_s1 }
  0x6c   : > { %p624_p2 = scmp.ne.s32.totalorder %s188_s13, %s623_s29  ;;  %p627_p4 = scmp.lt.u32.totalorder %s954_s30, %s623_s29 }
  0x6d   : > { %p629_p6 = scmp.lt.u32.totalorder %s623_s29, %s188_s13 }
  0x6e   : > { %p628_p5 = por %p627_p4, %p626_p3 }
  0x70   : > { %p630_p7 = por %p629_p6, %p628_p5 }
  0x72   : > { %p631_p8 = pnand %p630_p7, %p624_p2 }
  0x74   : > { %634 = shalt.err (!%p631_p8)  }
  0x75   : > { %s635_s22 = scalar_lea.vmem %s199_s10, 16  ;;  %p640_p11 = scmp.lt.s32.totalorder %s199_s10, %s939_s8 }
  0x76   : > { %p636_p10 = scmp.ne.s32.totalorder %s199_s10, %s635_s22  ;;  %p641_p12 = scmp.lt.s32.totalorder %s963_s11, %s635_s22 }
  0x78   : > { %p642_p0 = por %p641_p12, %p640_p11 }
  0x7a   : > { %p643_p1 = pnand %p642_p0, %p636_p10 }
  0x7c   : > { %646 = shalt.err (!%p643_p1)  }
  0x7d   : > { %201 = dma.hbm_to_vmem [thread:$0]  %s188_s13, 16, %s199_s10, [#allocation3 + $0x3] }
  0x7e   : > { %s459_s14 = sshll.u32 %s203_s23, 4  ;;  %s847_s29 = smov [#allocation2 + $0x5]  }
  0x7f   : > { %s205_s12 = scalar_lea.hbm %s1119_s1, %s459_s14  ;;  %s232_s27 = sshll.u32 %s847_s29, 4  ;;  %s233_s27 = int_to_ptr.vmem [resolvable:$true] %s232_s27 }
  0x80   : > { %s647_s7 = scalar_lea.hbm %s205_s12, 16  ;;  %p650_p3 = scmp.lt.u32.totalorder %s205_s12, %s1119_s1 }
  0x81   : > { %p648_p2 = scmp.ne.s32.totalorder %s205_s12, %s647_s7  ;;  %p651_p4 = scmp.lt.u32.totalorder %s954_s30, %s647_s7 }
  0x82   : > { %p653_p6 = scmp.lt.u32.totalorder %s647_s7, %s205_s12 }
  0x83   : > { %p652_p5 = por %p651_p4, %p650_p3 }
  0x85   : > { %p654_p7 = por %p653_p6, %p652_p5 }
  0x87   : > { %p655_p8 = pnand %p654_p7, %p648_p2 }
  0x89   : > { %658 = shalt.err (!%p655_p8)  }
  0x8a   : > { %s659_s10 = scalar_lea.vmem %s1005_s24, 16  ;;  %p664_p11 = scmp.lt.s32.totalorder %s1005_s24, %s939_s8 }
  0x8b   : > { %p660_p10 = scmp.ne.s32.totalorder %s1005_s24, %s659_s10  ;;  %p665_p12 = scmp.lt.s32.totalorder %s963_s11, %s659_s10 }
  0x8d   : > { %p666_p0 = por %p665_p12, %p664_p11 }
  0x8f   : > { %p667_p1 = pnand %p666_p0, %p660_p10 }
  0x91   : > { %670 = shalt.err (!%p667_p1)  }
  0x92   : > { %218 = dma.hbm_to_vmem [thread:$0]  %s205_s12, 16, %s1005_s24, [#allocation3 + $0x4] }
  0x93   : > { %s236_s23 = sadd.s32 6, %s931_s4  ;;  %s460_s13 = sshll.u32 %s1010_s20, 4 }
  0x94   : > { %s237_s16 = sld [smem:[#allocation5 + %s236_s23]]  ;;  %s222_s25 = scalar_lea.hbm %s1119_s1, %s460_s13 }
  0x95   : > { %s671_s6 = scalar_lea.hbm %s222_s25, 16  ;;  %p674_p3 = scmp.lt.u32.totalorder %s222_s25, %s1119_s1 }
  0x96   : > { %p672_p2 = scmp.ne.s32.totalorder %s222_s25, %s671_s6  ;;  %p675_p4 = scmp.lt.u32.totalorder %s954_s30, %s671_s6 }
  0x97   : > { %p677_p6 = scmp.lt.u32.totalorder %s671_s6, %s222_s25 }
  0x98   : > { %p676_p5 = por %p675_p4, %p674_p3 }
  0x9a   : > { %p678_p7 = por %p677_p6, %p676_p5 }
  0x9c   : > { %p679_p8 = pnand %p678_p7, %p672_p2 }
  0x9e   : > { %682 = shalt.err (!%p679_p8)  }
  0x9f   : > { %s683_s24 = scalar_lea.vmem %s233_s27, 16  ;;  %p688_p11 = scmp.lt.s32.totalorder %s233_s27, %s939_s8 }
  0xa0   : > { %p684_p10 = scmp.ne.s32.totalorder %s233_s27, %s683_s24  ;;  %p689_p12 = scmp.lt.s32.totalorder %s963_s11, %s683_s24 }
  0xa2   : > { %p690_p0 = por %p689_p12, %p688_p11 }
  0xa4   : > { %p691_p1 = pnand %p690_p0, %p684_p10 }
  0xa6   : > { %694 = shalt.err (!%p691_p1)  }
  0xa7   : > { %235 = dma.hbm_to_vmem [thread:$0]  %s222_s25, 16, %s233_s27, [#allocation3 + $0x5] }
  0xa8   : > { %s848_s20 = smov [#allocation2 + $0x6]   ;;  %s253_s9 = sadd.s32 7, %s931_s4 }
  0xa9   : > { %s249_s12 = sshll.u32 %s848_s20, 4  ;;  %s254_s15 = sld [smem:[#allocation5 + %s253_s9]]  ;;  %s250_s12 = int_to_ptr.vmem [resolvable:$true] %s249_s12 }
  0xaa   : > { %s461_s10 = sshll.u32 %s237_s16, 4  ;;  %s849_s23 = smov [#allocation2 + $0x7]  }
  0xab   : > { %s266_s13 = sshll.u32 %s849_s23, 4  ;;  %s239_s6 = scalar_lea.hbm %s1119_s1, %s461_s10  ;;  %s267_s13 = int_to_ptr.vmem [resolvable:$true] %s266_s13 }
  0xac   : > { %s695_s29 = scalar_lea.hbm %s239_s6, 16  ;;  %p698_p3 = scmp.lt.u32.totalorder %s239_s6, %s1119_s1 }
  0xad   : > { %p696_p2 = scmp.ne.s32.totalorder %s239_s6, %s695_s29  ;;  %p699_p4 = scmp.lt.u32.totalorder %s954_s30, %s695_s29 }
  0xae   : > { %p701_p6 = scmp.lt.u32.totalorder %s695_s29, %s239_s6 }
  0xaf   : > { %p700_p5 = por %p699_p4, %p698_p3 }
  0xb1   : > { %p702_p7 = por %p701_p6, %p700_p5 }
  0xb3   : > { %p703_p8 = pnand %p702_p7, %p696_p2 }
  0xb5   : > { %706 = shalt.err (!%p703_p8)  }
  0xb6   : > { %s707_s4 = scalar_lea.vmem %s250_s12, 16  ;;  %p712_p11 = scmp.lt.s32.totalorder %s250_s12, %s939_s8 }
  0xb7   : > { %p708_p10 = scmp.ne.s32.totalorder %s250_s12, %s707_s4  ;;  %p713_p12 = scmp.lt.s32.totalorder %s963_s11, %s707_s4 }
  0xb9   : > { %p714_p0 = por %p713_p12, %p712_p11 }
  0xbb   : > { %p715_p1 = pnand %p714_p0, %p708_p10 }
  0xbd   : > { %718 = shalt.err (!%p715_p1)  }
  0xbe   : > { %252 = dma.hbm_to_vmem [thread:$0]  %s239_s6, 16, %s250_s12, [#allocation3 + $0x6] }
  0xbf   : > { %s462_s27 = sshll.u32 %s254_s15, 4 }
  0xc0   : > { %s256_s20 = scalar_lea.hbm %s1119_s1, %s462_s27 }
  0xc1   : > { %s719_s9 = scalar_lea.hbm %s256_s20, 16  ;;  %p722_p3 = scmp.lt.u32.totalorder %s256_s20, %s1119_s1 }
  0xc2   : > { %p720_p2 = scmp.ne.s32.totalorder %s256_s20, %s719_s9  ;;  %p723_p4 = scmp.lt.u32.totalorder %s954_s30, %s719_s9 }
  0xc3   : > { %p725_p6 = scmp.lt.u32.totalorder %s719_s9, %s256_s20 }
  0xc4   : > { %p724_p5 = por %p723_p4, %p722_p3 }
  0xc6   : > { %p726_p7 = por %p725_p6, %p724_p5 }
  0xc8   : > { %p727_p8 = pnand %p726_p7, %p720_p2 }
  0xca   : > { %730 = shalt.err (!%p727_p8)  }
  0xcb   : > { %s731_s12 = scalar_lea.vmem %s267_s13, 16  ;;  %p736_p11 = scmp.lt.s32.totalorder %s267_s13, %s939_s8 }
  0xcc   : > { %p732_p10 = scmp.ne.s32.totalorder %s267_s13, %s731_s12  ;;  %p737_p12 = scmp.lt.s32.totalorder %s963_s11, %s731_s12 }
  0xce   : > { %p738_p0 = por %p737_p12, %p736_p11 }
  0xd0   : > { %p739_p1 = pnand %p738_p0, %p732_p10 }
  0xd2   : > { %742 = shalt.err (!%p739_p1)  }
  0xd3   : > { %269 = dma.hbm_to_vmem [thread:$0]  %s256_s20, 16, %s267_s13, [#allocation3 + $0x7] }
  0xd4   : > { %s129_s15 = scalar_lea.vmem [#allocation6], %s935_s5 }
  0xd5   : > { %797 = dma.done.wait [#allocation3], 16 }
  0xd6   : > { %798 = vsyncadd [#allocation3], 4294967280 }
  0xd7   : > { %799 = dma.done.wait [#allocation3 + $0x1], 16 }
  0xd8   : > { %800 = vsyncadd [#allocation3 + $0x1], 4294967280 }
  0xd9   : > { %801 = dma.done.wait [#allocation3 + $0x2], 16 }
  0xda   : > { %802 = vsyncadd [#allocation3 + $0x2], 4294967280 }
  0xdb   : > { %803 = dma.done.wait [#allocation3 + $0x3], 16 }
  0xdc   : > { %804 = vsyncadd [#allocation3 + $0x3], 4294967280 }
  0xdd   : > { %805 = dma.done.wait [#allocation3 + $0x4], 16 }
  0xde   : > { %806 = vsyncadd [#allocation3 + $0x4], 4294967280 }
  0xdf   : > { %807 = dma.done.wait [#allocation3 + $0x5], 16 }
  0xe0   : > { %808 = vsyncadd [#allocation3 + $0x5], 4294967280 }
  0xe1   : > { %809 = dma.done.wait [#allocation3 + $0x6], 16 }
  0xe2   : > { %810 = vsyncadd [#allocation3 + $0x6], 4294967280 }
  0xe3   : > { %811 = dma.done.wait [#allocation3 + $0x7], 16 }
  0xe4   : > { %812 = vsyncadd [#allocation3 + $0x7], 4294967280  ;;  %s464_s30 = sshll.u32 %s831_s19, 7  ;;  %s306_s5 = sshll.u32 %s129_s15, 4  ;;  %v287_v0 = vld [vmem:[#allocation2] sm:$0xff]  ;;  %s1071_s5 = int_to_ptr.vmem [resolvable:$true] %s306_s5 }
  0xe5   : > { %v288_v1 = vld [vmem:[%s1120_s2] sm:$0xff]  ;;  %s1069_s14 = scalar_lea.hbm %s1121_s3, %s464_s30  ;;  %s1130_s6 = sand.u32 1, %s823_s18  }
  0xe6   : > { %v289_v2 = vadd.f32 %v288_v1, %v287_v0  ;;  %s292_s19 = scalar_lea.sflag [#allocation7], %s1130_s6  ;;  %s743_s29 = scalar_lea.vmem %s1071_s5, 128 }
  0xe7   : > { %p744_p2 = scmp.ne.s32.totalorder %s1071_s5, %s743_s29  ;;  %s850_s7 = smov [#allocation6]  }
  0xe8   : > { %290 = vst [vmem:[%s129_s15] sm:$0xff] %v289_v2  ;;  %s747_s24 = sshll.u32 %s850_s7, 4  ;;  %s748_s24 = int_to_ptr.vmem [resolvable:$false] %s747_s24 }
  0xe9   : > { %p745_p3 = pnand %p744_p2, %p914_p9  ;;  %s749_s4 = scalar_lea.vmem %s748_s24, 256 }
  0xea   : > { %p750_p5 = scmp.lt.s32.totalorder %s1071_s5, %s748_s24  ;;  %p751_p6 = scmp.lt.s32.totalorder %s749_s4, %s743_s29 }
  0xeb   : > { %p746_p4 = pneg %p745_p3 }
  0xec   : > { %p752_p7 = por %p751_p6, %p750_p5 }
  0xee   : > { %p753_p8 = pnand %p752_p7, %p746_p4 }
  0xf0   : > { %756 = shalt.err (!%p753_p8)
}
  0xf1   : > { %s757_s27 = scalar_lea.hbm %s1069_s14, 128  ;;  %s761_s20 = scalar_lea.hbm %s1121_s3, 256 }
  0xf2   : > { %p758_p10 = scmp.ne.s32.totalorder %s1069_s14, %s757_s27  ;;  %p762_p0 = scmp.lt.u32.totalorder %s1069_s14, %s1121_s3 }
  0xf3   : > { %p763_p1 = scmp.lt.u32.totalorder %s761_s20, %s757_s27  ;;  %p765_p3 = scmp.lt.u32.totalorder %s757_s27, %s1069_s14 }
  0xf4   : > { %p759_p11 = pnand %p758_p10, %p914_p9 }
  0xf5   : > { %p764_p2 = por %p763_p1, %p762_p0 }
  0xf6   : > { %p760_p12 = pneg %p759_p11 }
  0xf7   : > { %p766_p4 = por %p765_p3, %p764_p2 }
  0xf9   : > { %p767_p5 = pnand %p766_p4, %p760_p12 }
  0xfb   : > { %770 = shalt.err (!%p767_p5)
}
  0xfc   : > { %475 = dma.vmem_to_hbm [thread:$0]  (%p914_p9), %s1071_s5, 128, %s1069_s14, %s292_s19  }
  0xfd PF: > { %p481_p6 = scmp.ge.s32.totalorder %s839_s21, 2  ;;  %s318_s23 = sand.u32 1, %s819_s17  }
  0xfe   : > { %s319_s12 = scalar_lea.sflag [#allocation7], %s318_s23 }
  0xff   : > { %p478_p7 = pnand %p481_p6, %p921_p13 }
 0x101   : > { %814 = dma.done.wait (!%p478_p7), %s319_s12, 128  }
 0x102   : > { %816 = vsyncadd (!%p478_p7), %s319_s12, 4294967168  ;;  %s22_s21 = sadd.s32 1, %s839_s21   ;;  %s1131_s26 = sld [smem:[#allocation38_spill]] }
 0x103   : > { %p19_p8 = scmp.ge.s32.totalorder %s22_s21, 4   ;;  %s1132_s19 = sld [smem:[#allocation36_spill]] }
 0x104   : > { %s1133_s20 = sld [smem:[#allocation37_spill]]  ;;  %s1134_s17 = smov %s823_s18 }
 0x105   : > { %s1135_s18 = smov %s827_s0  ;;  %21 = sbr.rel (!%p19_p8) target bundleno = 19 (0x13), region = 120 }
 0x108   : > { %s1136_s0 = smov %s1131_s26 }
 0x10c   :  { %324 = vsyncpa [#allocation7], 1 }
 0x10d   :  { %326 = vsyncpa [#allocation7 + $0x1], 1 }
 0x10e   :  { %327 = vsyncmov [#allocation3] }
 0x111   :  { %s328_s28 = vpop.sfrf %327 }
 0x112   :  { %p467_p9 = scmp.ne.s32.totalorder %s328_s28, 0 }
 0x114   :  { %332 = shalt.err (%p467_p9)  }
 0x115   :  { %334 = vsyncmov [#allocation3 + $0x1] }
 0x118   :  { %s335_s15 = vpop.sfrf %334 }
 0x119   :  { %p468_p13 = scmp.ne.s32.totalorder %s335_s15, 0 }
 0x11b   :  { %339 = shalt.err (%p468_p13)  }
 0x11c   :  { %341 = vsyncmov [#allocation3 + $0x2] }
 0x11f   :  { %s342_s30 = vpop.sfrf %341 }
 0x120   :  { %p469_p10 = scmp.ne.s32.totalorder %s342_s30, 0 }
 0x122   :  { %346 = shalt.err (%p469_p10)  }
 0x123   :  { %348 = vsyncmov [#allocation3 + $0x3] }
 0x126   :  { %s349_s5 = vpop.sfrf %348 }
 0x127   :  { %p470_p11 = scmp.ne.s32.totalorder %s349_s5, 0 }
 0x129   :  { %353 = shalt.err (%p470_p11)  }
 0x12a   :  { %355 = vsyncmov [#allocation3 + $0x4] }
 0x12d   :  { %s356_s21 = vpop.sfrf %355 }
 0x12e   :  { %p471_p12 = scmp.ne.s32.totalorder %s356_s21, 0 }
 0x130   :  { %360 = shalt.err (%p471_p12)  }
 0x131   :  { %362 = vsyncmov [#allocation3 + $0x5] }
 0x134   :  { %s363_s1 = vpop.sfrf %362 }
 0x135   :  { %p472_p0 = scmp.ne.s32.totalorder %s363_s1, 0 }
 0x137   :  { %367 = shalt.err (%p472_p0)  }
 0x138   :  { %369 = vsyncmov [#allocation3 + $0x6] }
 0x13b   :  { %s370_s2 = vpop.sfrf %369 }
 0x13c   :  { %p473_p1 = scmp.ne.s32.totalorder %s370_s2, 0 }
 0x13e   :  { %374 = shalt.err (%p473_p1)  }
 0x13f   :  { %376 = vsyncmov [#allocation3 + $0x7] }
 0x142   :  { %s377_s3 = vpop.sfrf %376 }
 0x143   :  { %p474_p2 = scmp.ne.s32.totalorder %s377_s3, 0 }
 0x145   :  { %381 = shalt.err (%p474_p2)  }

</bundles_post_ra>
